<compile_context>
chip_gen: v7x
topology: tpu7x:2x2x1
jax: 0.10.0
libtpu: 0.0.40
codegen_flags: <defaults>
</compile_context>

<pallas_src>
import math

import jax
import jax.numpy as jnp
from jax.experimental import pallas as pl
from jax.experimental.pallas import tpu as pltpu


def _round_up(x, m):
    return ((x + m - 1) // m) * m


def _altp_d_kernel(x_ref, w_ref, o_ref):
    # x_ref/o_ref: (tile_n, tile_l); w_ref: (1, tile_l)
    w = w_ref[...]
    w_relu = jnp.maximum(w, jnp.zeros_like(w))   # dtype-preserving relu
    o_ref[...] = x_ref[...] * w_relu             # sublane broadcast over rows


def _altp_d_kernel_bias(x_ref, w_ref, b_ref, o_ref):
    w = w_ref[...]
    w_relu = jnp.maximum(w, jnp.zeros_like(w))
    o_ref[...] = x_ref[...] * w_relu + b_ref[...]


def altp_d_forward(x, weight, bias=None,
                   max_tile_l=4096, target_block_bytes=2 * 1024 * 1024):
    """out = x * relu(weight) [+ bias].

    weight/bias have shape `shape`; x has shape (*leading, *shape) and the
    params broadcast over the leading dims (matches the PyTorch module).
    """
    p_shape = tuple(weight.shape)
    nd = len(p_shape)
    assert x.shape[x.ndim - nd:] == p_shape, \
        "trailing dims of x must equal the parameter shape"
    lead = x.shape[:x.ndim - nd]
    B = int(math.prod(lead)) if lead else 1
    L = int(math.prod(p_shape))

    out_dtype = x.dtype
    x2 = x.reshape(B, L)
    w2 = weight.reshape(1, L).astype(out_dtype)
    b2 = bias.reshape(1, L).astype(out_dtype) if bias is not None else None

    # Lane tiling: tile_l is a multiple of 128; pad L up to a multiple of
    # tile_l so the lane grid divides exactly (no masked partial stores).
    tile_l = min(_round_up(L, 128), max_tile_l)
    L_pad = _round_up(L, tile_l)
    if L_pad != L:
        pad = ((0, 0), (0, L_pad - L))
        x2 = jnp.pad(x2, pad)
        w2 = jnp.pad(w2, pad)          # relu(0) = 0 -> pad region of out is 0
        if b2 is not None:
            b2 = jnp.pad(b2, pad)

    # Row tiling: aim for ~target_block_bytes per block; full extent if the
    # batch is small, otherwise a multiple of 8 sublanes.
    itemsize = jnp.dtype(out_dtype).itemsize
    tile_n = max(8, target_block_bytes // (tile_l * itemsize))
    if B <= tile_n:
        tile_n = B
    else:
        tile_n = (tile_n // 8) * 8

    grid = (pl.cdiv(B, tile_n), L_pad // tile_l)

    x_spec = pl.BlockSpec((tile_n, tile_l), lambda n, l: (n, l))
    w_spec = pl.BlockSpec((1, tile_l), lambda n, l: (0, l))
    out_spec = pl.BlockSpec((tile_n, tile_l), lambda n, l: (n, l))

    # Explicit VMEM budget: double-buffered x + out blocks, resident params,
    # plus slack. Safe on v5e/v6e (128 MiB) and v7x (64 MiB).
    block_bytes = tile_n * tile_l * itemsize
    n_param_bufs = 2 * (2 if b2 is not None else 1)
    vmem_limit = 4 * block_bytes + n_param_bufs * tile_l * itemsize + (4 << 20)
    vmem_limit = int(min(max(vmem_limit, 16 << 20), 64 << 20))

    compiler_params = pltpu.CompilerParams(
        dimension_semantics=("parallel", "parallel"),
        vmem_limit_bytes=vmem_limit,
    )

    if b2 is not None:
        out = pl.pallas_call(
            _altp_d_kernel_bias,
            out_shape=jax.ShapeDtypeStruct((B, L_pad), out_dtype),
            grid=grid,
            in_specs=[x_spec, w_spec, w_spec],
            out_specs=out_spec,
            compiler_params=compiler_params,
        )(x2, w2, b2)
    else:
        out = pl.pallas_call(
            _altp_d_kernel,
            out_shape=jax.ShapeDtypeStruct((B, L_pad), out_dtype),
            grid=grid,
            in_specs=[x_spec, w_spec],
            out_specs=out_spec,
            compiler_params=compiler_params,
        )(x2, w2)

    if L_pad != L:
        out = out[:, :L]
    return out.reshape(x.shape)


def init_altp_d_params(key, shape, ones=True, bias=False, dtype=jnp.float32):
    """Deterministic init matching ALTP_D.reset_parameters()."""
    if ones:
        weight = 0.2339 + 0.3971 * jax.random.normal(key, shape, dtype=dtype)
    else:
        weight = jnp.zeros(shape, dtype=dtype)
    b = jnp.zeros(shape, dtype=dtype) if bias else None
    return weight, b


if __name__ == "__main__":
    key = jax.random.PRNGKey(0)
    k_x, k_w, k_x2, k_w2 = jax.random.split(key, 4)

    # Case 1: (N, C, H, W) = (2, 4, 16, 16); flattened L = 1024 (128-multiple).
    N, C, H, W = 2, 4, 16, 16
    param_shape = (C, H, W)
    x = jax.random.normal(k_x, (N, C, H, W), dtype=jnp.float32)
    weight, bias = init_altp_d_params(k_w, param_shape, ones=True, bias=True)

    out = jax.block_until_ready(altp_d_forward(x, weight, bias))
    ref = x * jnp.maximum(weight, 0.0)[None] + bias[None]
    assert out.shape == (N, C, H, W)
    assert jnp.allclose(out, ref, atol=1e-6, rtol=1e-6)

    # bias=False path.
    out_nb = jax.block_until_ready(altp_d_forward(x, weight, None))
    ref_nb = x * jnp.maximum(weight, 0.0)[None]
    assert jnp.allclose(out_nb, ref_nb, atol=1e-6, rtol=1e-6)

    # Case 2: non-128-multiple flattened size (exercises the lane-pad path).
    N2, C2, H2, W2 = 3, 3, 7, 7
    x2 = jax.random.normal(k_x2, (N2, C2, H2, W2), dtype=jnp.float32)
    w2, b2 = init_altp_d_params(k_w2, (C2, H2, W2), ones=True, bias=True)
    out2 = jax.block_until_ready(altp_d_forward(x2, w2, b2))
    ref2 = x2 * jnp.maximum(w2, 0.0)[None] + b2[None]
    assert out2.shape == (N2, C2, H2, W2)
    assert jnp.allclose(out2, ref2, atol=1e-6, rtol=1e-6)

    print("KERNEL_OK")
</pallas_src>

<mosaic_0001>
module attributes {stable_mosaic.version = 11 : i64} {
  func.func @_altp_d_kernel_bias(%arg0: i32, %arg1: i32, %arg2: memref<2x1024xf32, #tpu.memory_space<vmem>>, %arg3: memref<1x1024xf32, #tpu.memory_space<vmem>>, %arg4: memref<1x1024xf32, #tpu.memory_space<vmem>>, %arg5: memref<2x1024xf32, #tpu.memory_space<vmem>>) attributes {dimension_semantics = [#tpu.dimension_semantics<parallel>, #tpu.dimension_semantics<parallel>], iteration_bounds = array<i64: 1, 1>, scalar_prefetch = 0 : i64, scratch_operands = 0 : i64, tpu.core_type = #tpu.core_type<tc>, window_params = [{transform_indices = @transform_0, window_bounds = array<i64: 2, 1024>}, {transform_indices = @transform_1, window_bounds = array<i64: 1, 1024>}, {transform_indices = @transform_2, window_bounds = array<i64: 1, 1024>}, {transform_indices = @transform_3, window_bounds = array<i64: 2, 1024>}]} {
    %c0 = arith.constant 0 : index
    %c0_0 = arith.constant 0 : index
    %0 = vector.load %arg3[%c0, %c0_0] : memref<1x1024xf32, #tpu.memory_space<vmem>>, vector<1x1024xf32>
    %cst = arith.constant 0.000000e+00 : f32
    %1 = vector.broadcast %cst : f32 to vector<1x1024xf32>
    %2 = arith.maximumf %0, %1 : vector<1x1024xf32>
    %c0_1 = arith.constant 0 : index
    %c0_2 = arith.constant 0 : index
    %3 = vector.load %arg2[%c0_1, %c0_2] : memref<2x1024xf32, #tpu.memory_space<vmem>>, vector<2x1024xf32>
    %4 = vector.broadcast %2 : vector<1x1024xf32> to vector<2x1024xf32>
    %5 = arith.mulf %3, %4 : vector<2x1024xf32>
    %c0_3 = arith.constant 0 : index
    %c0_4 = arith.constant 0 : index
    %6 = vector.load %arg4[%c0_3, %c0_4] : memref<1x1024xf32, #tpu.memory_space<vmem>>, vector<1x1024xf32>
    %7 = vector.broadcast %6 : vector<1x1024xf32> to vector<2x1024xf32>
    %8 = arith.addf %5, %7 : vector<2x1024xf32>
    %c0_5 = arith.constant 0 : index
    %c0_6 = arith.constant 0 : index
    %9 = vector.load %arg5[%c0_5, %c0_6] : memref<2x1024xf32, #tpu.memory_space<vmem>>, vector<2x1024xf32>
    tpu.vector_store %arg5[%c0_5, %c0_6], %8 {strides = array<i32>} : memref<2x1024xf32, #tpu.memory_space<vmem>>, vector<2x1024xf32>,
    return
  }
  func.func @transform_0(%arg0: i32, %arg1: i32) -> (i32, i32) {
    %c0_i32 = arith.constant 0 : i32
    return %arg0, %arg1 : i32, i32
  }
  func.func @transform_1(%arg0: i32, %arg1: i32) -> (i32, i32) {
    %c0_i32 = arith.constant 0 : i32
    %c0_i32_0 = arith.constant 0 : i32
    return %c0_i32, %arg1 : i32, i32
  }
  func.func @transform_2(%arg0: i32, %arg1: i32) -> (i32, i32) {
    %c0_i32 = arith.constant 0 : i32
    %c0_i32_0 = arith.constant 0 : i32
    return %c0_i32, %arg1 : i32, i32
  }
  func.func @transform_3(%arg0: i32, %arg1: i32) -> (i32, i32) {
    %c0_i32 = arith.constant 0 : i32
    return %arg0, %arg1 : i32, i32
  }
}

</mosaic_0001>

<bundles_post_ra>
// kernel: tpu_custom_call.1
= control target key start
LH: loop header
LB: loop body
LE: loop exit
PB: predicated region body
PF: predicated region fallthrough
CT: control target
= control target key end

     0   :  { %8 = vsyncpa [#allocation3], 0  ;;  %s387_s0 = inlined_call_operand.hbm [shape: f32[2,1024], index: 0, kind: input, shape index: {}]   ;;  %s388_s1 = inlined_call_operand.hbm [shape: f32[1,1024], index: 1, kind: input, shape index: {}]   ;;  %s389_s2 = inlined_call_operand.hbm [shape: f32[1,1024], index: 2, kind: input, shape index: {}]   ;;  %s390_s3 = inlined_call_operand.hbm [shape: f32[2,1024], index: 3, kind: output, shape index: {}]  }
   0x1   :  { %9 = vsyncpa [#allocation6], 0 }
   0x2   :  { %10 = vsyncpa [#allocation4], 0  ;;  %s314_s12 = smov [#allocation5]   ;;  %s315_s14 = smov [#allocation2]  }
   0x3   :  { %s27_s13 = sshll.u32 %s314_s12, 4  ;;  %s17_s15 = sshll.u32 %s315_s14, 4  ;;  %s28_s13 = int_to_ptr.vmem [resolvable:$true] %s27_s13  ;;  %s18_s15 = int_to_ptr.vmem [resolvable:$true] %s17_s15 }
   0x4   :  { %s220_s18 = scalar_lea.hbm %s388_s1, 128 }
   0x5   :  { %p221_p0 = scmp.ne.s32.totalorder %s388_s1, %s220_s18  ;;  %p224_p1 = scmp.lt.u32.totalorder %s220_s18, %s388_s1 }
   0x7   :  { %p226_p2 = pnand %p224_p1, %p221_p0 }
   0x9   :  { %229 = shalt.err (!%p226_p2)
}
   0xa   :  { %s230_s23 = scalar_lea.vmem %s28_s13, 128  ;;  %p235_p4 = scmp.lt.s32.totalorder %s28_s13, %s28_s13 }
   0xb   :  { %p231_p3 = scmp.ne.s32.totalorder %s28_s13, %s230_s23  ;;  %p236_p5 = scmp.lt.s32.totalorder %s230_s23, %s230_s23 }
   0xd   :  { %p237_p6 = por %p236_p5, %p235_p4 }
   0xf   :  { %p238_p7 = pnand %p237_p6, %p231_p3 }
  0x11   :  { %241 = shalt.err (!%p238_p7)
}
  0x12   :  { %30 = dma.hbm_to_vmem [thread:$0]  %s388_s1, 128, %s28_s13, [#allocation6]  }
  0x13   :  { %s242_s28 = scalar_lea.hbm %s387_s0, 256 }
  0x14   :  { %p243_p8 = scmp.ne.s32.totalorder %s387_s0, %s242_s28  ;;  %p246_p9 = scmp.lt.u32.totalorder %s242_s28, %s387_s0 }
  0x16   :  { %p248_p10 = pnand %p246_p9, %p243_p8 }
  0x18   :  { %251 = shalt.err (!%p248_p10)
}
  0x19   :  { %s252_s6 = scalar_lea.vmem %s18_s15, 256  ;;  %p257_p12 = scmp.lt.s32.totalorder %s18_s15, %s18_s15 }
  0x1a   :  { %p253_p11 = scmp.ne.s32.totalorder %s18_s15, %s252_s6  ;;  %p258_p13 = scmp.lt.s32.totalorder %s252_s6, %s252_s6 }
  0x1c   :  { %p259_p0 = por %p258_p13, %p257_p12 }
  0x1e   :  { %p260_p1 = pnand %p259_p0, %p253_p11 }
  0x20   :  { %263 = shalt.err (!%p260_p1)
}
  0x21   :  { %20 = dma.hbm_to_vmem [thread:$0]  %s387_s0, 256, %s18_s15, [#allocation3]  }
  0x22   :  { %s316_s8 = smov [#allocation7]   ;;  %s264_s12 = scalar_lea.hbm %s389_s2, 128 }
  0x23   :  { %s37_s9 = sshll.u32 %s316_s8, 4  ;;  %p265_p2 = scmp.ne.s32.totalorder %s389_s2, %s264_s12  ;;  %s38_s9 = int_to_ptr.vmem [resolvable:$true] %s37_s9 }
  0x24   :  { %p268_p3 = scmp.lt.u32.totalorder %s264_s12, %s389_s2 }
  0x26   :  { %p270_p4 = pnand %p268_p3, %p265_p2 }
  0x28   :  { %273 = shalt.err (!%p270_p4)
}
  0x29   :  { %s274_s18 = scalar_lea.vmem %s38_s9, 128  ;;  %p279_p6 = scmp.lt.s32.totalorder %s38_s9, %s38_s9 }
  0x2a   :  { %p275_p5 = scmp.ne.s32.totalorder %s38_s9, %s274_s18  ;;  %p280_p7 = scmp.lt.s32.totalorder %s274_s18, %s274_s18 }
  0x2c   :  { %p281_p8 = por %p280_p7, %p279_p6 }
  0x2e   :  { %p282_p9 = pnand %p281_p8, %p275_p5 }
  0x30   :  { %285 = shalt.err (!%p282_p9)
}
  0x31   :  { %40 = dma.hbm_to_vmem [thread:$0]  %s389_s2, 128, %s38_s9, [#allocation6]  }
  0x32   :  { %308 = dma.done.wait [#allocation3], 256  }
  0x33   :  { %309 = vsyncadd [#allocation3], 4294967040 }
  0x34   :  { %310 = dma.done.wait [#allocation6], 256  }
  0x35   :  { %311 = vsyncadd [#allocation6], 4294967040  ;;  %v55_v0 = vlaneseq  ;;  %v317_v1 = vmov 1983009808   ;;  %v50_v10 = vld [vmem:[#allocation5] sm:$0xff]  ;;  %v125_v11 = vld [vmem:[#allocation7] sm:$0xff] }
  0x36   :  { %v90_v2 = vunpack.c.l.s4 %v317_v1  ;;  %v51_v16 = vmax.f32 %v50_v10, 0.0  ;;  %v52_v44 = vld [vmem:[#allocation2] sm:$0xff]  ;;  %v53_v51 = vld [vmem:[#allocation2 + $0x8] sm:$0xff]  ;;  %s318_s2 = smov [#allocation8]  }
  0x37   :  { %v56_v3 = vshrl.u32 %v55_v0, 7  ;;  %s205_s19 = sshll.u32 %s318_s2, 4  ;;  %s206_s19 = int_to_ptr.vmem [resolvable:$true] %s205_s19 }
  0x38   :  { %v91_v4 = vunpack.c.0.s8 %v90_v2  ;;  %s286_s20 = scalar_lea.vmem %s206_s19, 256  ;;  %p291_p11 = scmp.lt.s32.totalorder %s206_s19, %s206_s19 }
  0x39   :  { %v57_v5 = vsub.s32 0, %v56_v3  ;;  %v61_v6 = vsub.s32 1, %v56_v3  ;;  %v65_v7 = vsub.s32 2, %v56_v3  ;;  %v69_v8 = vsub.s32 3, %v56_v3  ;;  %p287_p10 = scmp.ne.s32.totalorder %s206_s19, %s286_s20  ;;  %p292_p12 = scmp.lt.s32.totalorder %s286_s20, %s286_s20 }
  0x3a   :  { %v94_v9 = vsub.s32 %v91_v4, %v56_v3  ;;  %v73_v12 = vsub.s32 4, %v56_v3  ;;  %v77_v13 = vsub.s32 5, %v56_v3  ;;  %v81_v14 = vsub.s32 6, %v56_v3 }
  0x3b   :  { %v85_v15 = vsub.s32 7, %v56_v3  ;;  %v130_v17 = vrot.slane %v125_v11, %v57_v5  ;;  %v134_v18 = vrot.slane %v125_v11, %v61_v6  ;;  %v138_v19 = vrot.slane %v125_v11, %v65_v7  ;;  %p293_p13 = por %p292_p12, %p291_p11 }
  0x3c   :  { %v142_v20 = vrot.slane %v125_v11, %v69_v8  ;;  %v146_v21 = vrot.slane %v125_v11, %v73_v12  ;;  %v150_v22 = vrot.slane %v125_v11, %v77_v13  ;;  %v154_v23 = vrot.slane %v125_v11, %v81_v14 }
  0x3d   :  { %v58_v24 = vrot.slane %v51_v16, %v57_v5  ;;  %v62_v25 = vrot.slane %v51_v16, %v61_v6  ;;  %v66_v26 = vrot.slane %v51_v16, %v65_v7  ;;  %v70_v27 = vrot.slane %v51_v16, %v69_v8  ;;  %p294_p0 = pnand %p293_p13, %p287_p10 }
  0x3e   :  { %v159_v28 = vcombine.low %v130_v17, %v134_v18  ;;  %v160_v29 = vcombine.low %v138_v19, %v142_v20  ;;  %v74_v30 = vrot.slane %v51_v16, %v73_v12  ;;  %v78_v31 = vrot.slane %v51_v16, %v77_v13 }
  0x3f   :  { %v87_v32 = vcombine.low %v58_v24, %v62_v25  ;;  %v88_v33 = vcombine.low %v66_v26, %v70_v27  ;;  %v82_v34 = vrot.slane %v51_v16, %v81_v14  ;;  %v86_v35 = vrot.slane %v51_v16, %v85_v15 }
  0x40   :  { %v167_v36 = vrot.slane %v159_v28, %v94_v9  ;;  %v174_v37 = vrot.slane %v160_v29, %v94_v9  ;;  %v104_v38 = vcombine.low %v74_v30, %v78_v31  ;;  %v158_v39 = vrot.slane %v125_v11, %v85_v15 }
  0x41   :  { %v95_v40 = vrot.slane %v87_v32, %v94_v9  ;;  %v102_v41 = vrot.slane %v88_v33, %v94_v9  ;;  %v105_v42 = vcombine.low %v82_v34, %v86_v35  ;;  %v176_v43 = vcombine.low %v146_v21, %v150_v22 }
  0x42   :  { %v112_v45 = vrot.slane %v104_v38, %v94_v9  ;;  %v177_v46 = vcombine.low %v154_v23, %v158_v39  ;;  %v175_v48 = vcombine.low %v167_v36, %v174_v37 }
  0x43   :  { %v103_v47 = vcombine.low %v95_v40, %v102_v41  ;;  %v119_v49 = vrot.slane %v105_v42, %v94_v9  ;;  %v184_v50 = vrot.slane %v176_v43, %v94_v9 }
  0x44   :  { %v191_v52 = vrot.slane %v177_v46, %v94_v9 }
  0x45   :  { %v123_v53 = vmul.f32 %v103_v47, %v52_v44  ;;  %v120_v54 = vcombine.low %v112_v45, %v119_v49 }
  0x46   :  { %v192_v55 = vcombine.low %v184_v50, %v191_v52 }
  0x47   :  { %v195_v56 = vadd.f32 %v175_v48, %v123_v53  ;;  %v124_v57 = vmul.f32 %v120_v54, %v53_v51 }
  0x49   :  { %197 = vst [vmem:[#allocation8] sm:$0xff] %v195_v56  ;;  %v196_v58 = vadd.f32 %v192_v55, %v124_v57 }
  0x4b   :  { %198 = vst [vmem:[#allocation8 + $0x8] sm:$0xff] %v196_v58 }
  0x4c   :  { %297 = shalt.err (!%p294_p0)
}
  0x4d   :  { %s298_s23 = scalar_lea.hbm %s390_s3, 256 }
  0x4e   :  { %p299_p1 = scmp.ne.s32.totalorder %s390_s3, %s298_s23  ;;  %p302_p2 = scmp.lt.u32.totalorder %s298_s23, %s390_s3 }
  0x50   :  { %p304_p3 = pnand %p302_p2, %p299_p1 }
  0x52   :  { %307 = shalt.err (!%p304_p3)
}
  0x53   :  { %208 = dma.vmem_to_hbm [thread:$0]  %s206_s19, 256, %s390_s3, [#allocation4]  }
  0x54   :  { %312 = dma.done.wait [#allocation4], 256  }
  0x55   :  { %313 = vsyncadd [#allocation4], 4294967040 }
  0x56   :  { %212 = vsyncpa [#allocation3], 1 }
  0x57   :  { %213 = vsyncpa [#allocation6], 1 }
  0x58   :  { %214 = vsyncpa [#allocation4], 1 }

</bundles_post_ra>
